<compile_context>
chip_gen: v7x
topology: tpu7x:2x2x1
jax: 0.10.0
libtpu: 0.0.40
codegen_flags: <defaults>
</compile_context>

<pallas_src>
import jax
import jax.numpy as jnp
from jax.experimental import pallas as pl
from jax.experimental.pallas import tpu as pltpu


def _round_up(x, m):
    return ((x + m - 1) // m) * m


def _proto_kernel(deg_ref, spt_ref, out_ref, acc_ref, tot_ref):
    # deg_ref: (TN, 1) f32     — unnormalized degrees for this N-tile
    # spt_ref: (TN, TD) in-dtype — support embeddings tile
    # out_ref: (1, TD) in-dtype  — prototype slice (written at finalize only)
    # acc_ref: (1, TD) f32 scratch — unnormalized weighted-sum accumulator
    # tot_ref: (1, 1)  f32 scratch — running degree total
    k = pl.program_id(1)

    @pl.when(k == 0)
    def _init():
        acc_ref[...] = jnp.zeros_like(acc_ref)
        tot_ref[...] = jnp.zeros_like(tot_ref)

    deg = deg_ref[...]                         # (TN, 1) f32
    spt = spt_ref[...].astype(jnp.float32)     # (TN, TD) f32

    # VPU broadcast-multiply (lane-broadcast of the degree column) followed by
    # a cross-sublane reduce; accumulate unnormalized so tiles are independent
    # of the global degree sum.
    acc_ref[...] += jnp.sum(spt * deg, axis=0, keepdims=True)
    tot_ref[...] += jnp.sum(deg, axis=0, keepdims=True)

    @pl.when(k == pl.num_programs(1) - 1)
    def _finalize():
        # Deferred normalization: one reciprocal, then TD multiplies.
        inv = pl.reciprocal(tot_ref[...], approx=False)     # (1, 1) f32
        out_ref[...] = (acc_ref[...] * inv).astype(out_ref.dtype)


def proto_repre(spt_embedding_i, degree_list_i, *, tile_n=512, tile_d=512):
    """spt_embedding_i: [N, D]; degree_list_i: [N]. Returns ([1, D], None)."""
    N, D = spt_embedding_i.shape

    # Keep degrees in f32 regardless of embedding dtype (normalization
    # precision matches the PyTorch f32 path). Column layout -> sublane axis.
    deg = degree_list_i.astype(jnp.float32).reshape(N, 1)

    # --- N (reduction) tiling: multiple of 8 sublanes; padded rows carry zero
    # degree so they contribute nothing to the sum or the total. -------------
    TN = min(tile_n, _round_up(N, 8))
    N_pad = _round_up(N, TN)
    if N_pad != N:
        pad = N_pad - N
        spt_p = jnp.pad(spt_embedding_i, ((0, pad), (0, 0)))
        deg_p = jnp.pad(deg, ((0, pad), (0, 0)))
    else:
        spt_p, deg_p = spt_embedding_i, deg

    # --- D (lane) tiling: tile only when tiles stay lane-dense (x128);
    # otherwise a single full-row block (block == full dim is always legal). --
    if D % 128 == 0 and D > tile_d and D % tile_d == 0:
        TD = tile_d
    else:
        TD = D

    grid = (D // TD, N_pad // TN)  # (parallel D axis, reduction axis last)

    itemsize = jnp.dtype(spt_embedding_i.dtype).itemsize
    cost = pl.CostEstimate(
        flops=2 * N_pad * D + N_pad,
        transcendentals=0,
        bytes_accessed=N_pad * D * itemsize + N_pad * 4 + D * itemsize,
    )

    out = pl.pallas_call(
        _proto_kernel,
        out_shape=jax.ShapeDtypeStruct((1, D), spt_embedding_i.dtype),
        grid_spec=pltpu.PrefetchScalarGridSpec(
            num_scalar_prefetch=0,
            grid=grid,
            in_specs=[
                pl.BlockSpec((TN, 1), lambda j, k: (k, 0)),    # degrees
                pl.BlockSpec((TN, TD), lambda j, k: (k, j)),   # support embeddings
            ],
            out_specs=pl.BlockSpec((1, TD), lambda j, k: (0, j)),
            scratch_shapes=[
                pltpu.VMEM((1, TD), jnp.float32),   # weighted-sum accumulator
                pltpu.VMEM((1, 1), jnp.float32),    # running degree total
            ],
        ),
        compiler_params=pltpu.CompilerParams(
            dimension_semantics=("parallel", "arbitrary"),
        ),
        cost_estimate=cost,
    )(deg_p, spt_p)

    return out, None


if __name__ == "__main__":
    key = jax.random.PRNGKey(0)
    k1, k2, k3, k4 = jax.random.split(key, 4)

    # ---- Case 1: shapes matching the module's typical per-episode call. ----
    N, D = 8, 32
    spt = jax.random.normal(k1, (N, D), dtype=jnp.float32)
    degree = jax.random.uniform(k2, (N,), dtype=jnp.float32, minval=0.5, maxval=5.0)

    proto, none_out = proto_repre(spt, degree)
    proto = jax.block_until_ready(proto)

    norm_deg = degree / jnp.sum(degree)
    ref = jnp.sum(spt * norm_deg[:, None], axis=0)[None, :]
    assert proto.shape == (1, D)
    assert none_out is None
    assert jnp.allclose(proto, ref, atol=1e-5, rtol=1e-5)

    # ---- Case 2: small shapes that still exercise the tiled reduction path
    # (grid = (2 D-tiles, 3 N-tiles)) to validate accumulate/finalize. -------
    N2, D2 = 24, 256
    spt2 = jax.random.normal(k3, (N2, D2), dtype=jnp.float32)
    degree2 = jax.random.uniform(k4, (N2,), dtype=jnp.float32, minval=0.5, maxval=5.0)

    proto2, _ = proto_repre(spt2, degree2, tile_n=8, tile_d=128)
    proto2 = jax.block_until_ready(proto2)

    norm_deg2 = degree2 / jnp.sum(degree2)
    ref2 = jnp.sum(spt2 * norm_deg2[:, None], axis=0)[None, :]
    assert proto2.shape == (1, D2)
    assert jnp.allclose(proto2, ref2, atol=1e-5, rtol=1e-5)

    print("KERNEL_OK")
</pallas_src>

<mosaic_0001>
module attributes {stable_mosaic.version = 11 : i64} {
  func.func @_proto_kernel(%arg0: i32, %arg1: i32, %arg2: memref<8x1xf32, #tpu.memory_space<vmem>>, %arg3: memref<8x32xf32, #tpu.memory_space<vmem>>, %arg4: memref<1x32xf32, #tpu.memory_space<vmem>>, %arg5: memref<1x32xf32, #tpu.memory_space<vmem>>, %arg6: memref<1x1xf32, #tpu.memory_space<vmem>>) attributes {dimension_semantics = [#tpu.dimension_semantics<parallel>, #tpu.dimension_semantics<arbitrary>], iteration_bounds = array<i64: 1, 1>, scalar_prefetch = 0 : i64, scratch_operands = 2 : i64, tpu.core_type = #tpu.core_type<tc>, window_params = [{transform_indices = @transform_0, window_bounds = array<i64: 8, 1>}, {transform_indices = @transform_1, window_bounds = array<i64: 8, 32>}, {transform_indices = @transform_2, window_bounds = array<i64: 1, 32>}]} {
    %c0_i32 = arith.constant 0 : i32
    %0 = arith.cmpi eq, %arg1, %c0_i32 : i32
    %1 = arith.extui %0 : i1 to i32
    %c0_i32_0 = arith.constant 0 : i32
    %2 = arith.cmpi ne, %1, %c0_i32_0 : i32
    scf.if %2 {
      %cst_15 = arith.constant 0.000000e+00 : f32
      %20 = vector.broadcast %cst_15 : f32 to vector<1x32xf32>
      %c0_16 = arith.constant 0 : index
      %c0_17 = arith.constant 0 : index
      %21 = vector.load %arg5[%c0_16, %c0_17] : memref<1x32xf32, #tpu.memory_space<vmem>>, vector<1x32xf32>
      tpu.vector_store %arg5[%c0_16, %c0_17], %20 {strides = array<i32>} : memref<1x32xf32, #tpu.memory_space<vmem>>, vector<1x32xf32>,
      %cst_18 = arith.constant 0.000000e+00 : f32
      %22 = vector.broadcast %cst_18 : f32 to vector<1x1xf32>
      %c0_19 = arith.constant 0 : index
      %c0_20 = arith.constant 0 : index
      %23 = vector.load %arg6[%c0_19, %c0_20] : memref<1x1xf32, #tpu.memory_space<vmem>>, vector<1x1xf32>
      tpu.vector_store %arg6[%c0_19, %c0_20], %22 {strides = array<i32>} : memref<1x1xf32, #tpu.memory_space<vmem>>, vector<1x1xf32>,
    } else {
    }
    %c0 = arith.constant 0 : index
    %c0_1 = arith.constant 0 : index
    %3 = vector.load %arg2[%c0, %c0_1] : memref<8x1xf32, #tpu.memory_space<vmem>>, vector<8x1xf32>
    %c0_2 = arith.constant 0 : index
    %c0_3 = arith.constant 0 : index
    %4 = vector.load %arg3[%c0_2, %c0_3] : memref<8x32xf32, #tpu.memory_space<vmem>>, vector<8x32xf32>
    %c0_4 = arith.constant 0 : index
    %c0_5 = arith.constant 0 : index
    %5 = vector.load %arg5[%c0_4, %c0_5] : memref<1x32xf32, #tpu.memory_space<vmem>>, vector<1x32xf32>
    %6 = vector.broadcast %3 : vector<8x1xf32> to vector<8x32xf32>
    %7 = arith.mulf %4, %6 : vector<8x32xf32>
    %cst = arith.constant dense<0.000000e+00> : vector<32xf32>
    %8 = vector.multi_reduction <add>, %7, %cst [0] : vector<8x32xf32> to vector<32xf32>
    %9 = vector.shape_cast %8 : vector<32xf32> to vector<1x32xf32>
    %10 = arith.addf %5, %9 : vector<1x32xf32>
    %c0_6 = arith.constant 0 : index
    %c0_7 = arith.constant 0 : index
    %11 = vector.load %arg5[%c0_6, %c0_7] : memref<1x32xf32, #tpu.memory_space<vmem>>, vector<1x32xf32>
    tpu.vector_store %arg5[%c0_6, %c0_7], %10 {strides = array<i32>} : memref<1x32xf32, #tpu.memory_space<vmem>>, vector<1x32xf32>,
    %c0_8 = arith.constant 0 : index
    %c0_9 = arith.constant 0 : index
    %12 = vector.load %arg6[%c0_8, %c0_9] : memref<1x1xf32, #tpu.memory_space<vmem>>, vector<1x1xf32>
    %cst_10 = arith.constant dense<0.000000e+00> : vector<1xf32>
    %13 = vector.multi_reduction <add>, %3, %cst_10 [0] : vector<8x1xf32> to vector<1xf32>
    %14 = vector.shape_cast %13 : vector<1xf32> to vector<1x1xf32>
    %15 = arith.addf %12, %14 : vector<1x1xf32>
    %c0_11 = arith.constant 0 : index
    %c0_12 = arith.constant 0 : index
    %16 = vector.load %arg6[%c0_11, %c0_12] : memref<1x1xf32, #tpu.memory_space<vmem>>, vector<1x1xf32>
    tpu.vector_store %arg6[%c0_11, %c0_12], %15 {strides = array<i32>} : memref<1x1xf32, #tpu.memory_space<vmem>>, vector<1x1xf32>,
    %c0_i32_13 = arith.constant 0 : i32
    %17 = arith.cmpi eq, %arg1, %c0_i32_13 : i32
    %18 = arith.extui %17 : i1 to i32
    %c0_i32_14 = arith.constant 0 : i32
    %19 = arith.cmpi ne, %18, %c0_i32_14 : i32
    scf.if %19 {
      %c0_15 = arith.constant 0 : index
      %c0_16 = arith.constant 0 : index
      %20 = vector.load %arg6[%c0_15, %c0_16] : memref<1x1xf32, #tpu.memory_space<vmem>>, vector<1x1xf32>
      %21 = tpu.reciprocal %20 : vector<1x1xf32> -> vector<1x1xf32>
      %c0_17 = arith.constant 0 : index
      %c0_18 = arith.constant 0 : index
      %22 = vector.load %arg5[%c0_17, %c0_18] : memref<1x32xf32, #tpu.memory_space<vmem>>, vector<1x32xf32>
      %23 = vector.broadcast %21 : vector<1x1xf32> to vector<1x32xf32>
      %24 = arith.mulf %22, %23 : vector<1x32xf32>
      %c0_19 = arith.constant 0 : index
      %c0_20 = arith.constant 0 : index
      %25 = vector.load %arg4[%c0_19, %c0_20] : memref<1x32xf32, #tpu.memory_space<vmem>>, vector<1x32xf32>
      tpu.vector_store %arg4[%c0_19, %c0_20], %24 {strides = array<i32>} : memref<1x32xf32, #tpu.memory_space<vmem>>, vector<1x32xf32>,
    } else {
    }
    return
  }
  func.func @transform_0(%arg0: i32, %arg1: i32) -> (i32, i32) {
    %c0_i32 = arith.constant 0 : i32
    %c0_i32_0 = arith.constant 0 : i32
    return %arg1, %c0_i32 : i32, i32
  }
  func.func @transform_1(%arg0: i32, %arg1: i32) -> (i32, i32) {
    %c0_i32 = arith.constant 0 : i32
    return %arg1, %arg0 : i32, i32
  }
  func.func @transform_2(%arg0: i32, %arg1: i32) -> (i32, i32) {
    %c0_i32 = arith.constant 0 : i32
    %c0_i32_0 = arith.constant 0 : i32
    return %c0_i32, %arg0 : i32, i32
  }
}

</mosaic_0001>

<bundles_post_ra>
// kernel: tpu_custom_call.1
= control target key start
LH: loop header
LB: loop body
LE: loop exit
PB: predicated region body
PF: predicated region fallthrough
CT: control target
= control target key end

     0   :  { %vm41_vm0 = vcmask 7168   ;;  %vm18_vm1 = vcmask 0   ;;  %v113_v1 = vmov 0   ;;  %v114_v2 = vmov 0.0   ;;  %s154_s0 = inlined_call_operand.vmem [shape: f32[8,1], index: 0, kind: input, shape index: {}]   ;;  %s155_s1 = inlined_call_operand.vmem [shape: f32[8,32], index: 1, kind: input, shape index: {}]   ;;  %s156_s2 = inlined_call_operand.hbm [shape: f32[1,32], index: 2, kind: output, shape index: {}]  }
   0x1   :  { %v20_v0 = vld [vmem:[%s154_s0] sm:$0xff]  ;;  %86 = vset.pattern.permute.xlu0 %v113_v1  ;;  %19 = vst.msk [vmem:[#allocation3] sm:$0x1] %vm18_vm1, %v114_v2 }
   0x2   :  { %v42_v3 = vsel %vm41_vm0, %v20_v0, 0.0 }
   0x3   :  { %7 = vsyncpa [#allocation5], 0  ;;  %25 = vperm.xlu0 %86, %v20_v0   ;;  %v43_v4 = vrot.slane %v42_v3, 4  ;;  %vm16_vm2 = vcmask 253952   ;;  %v21_v14 = vld [vmem:[%s155_s1] sm:$0xff]  ;;  %vm29_vm3 = vcmask 261120   ;;  %v63_v26 = vlaneseq }
   0x4   :  { %17 = vst.msk [vmem:[#allocation2] sm:$0x1] %vm16_vm2, %v114_v2  ;;  %s115_s12 = smov [#allocation4]  }
   0x5   :  { %v44_v5 = vadd.f32 %v43_v4, %v42_v3  ;;  %v64_v27 = vshrl.u32 %v63_v26, 7  ;;  %s75_s1 = sshll.u32 %s115_s12, 4  ;;  %s76_s1 = int_to_ptr.vmem [resolvable:$true] %s75_s1 }
   0x6   :  { %s89_s13 = scalar_lea.vmem %s76_s1, 16  ;;  %s93_s14 = scalar_lea.vmem %s76_s1, 32 }
   0x7   :  { %v45_v6 = vrot.slane %v44_v5, 2  ;;  %v65_v28 = vsub.s32 0, %v64_v27  ;;  %p90_p0 = scmp.ne.s32.totalorder %s76_s1, %s89_s13  ;;  %p94_p1 = scmp.lt.s32.totalorder %s76_s1, %s76_s1 }
   0x8   :  { %v40_v9 = vld [vmem:[#allocation3] sm:$0x1]  ;;  %p95_p2 = scmp.lt.s32.totalorder %s93_s14, %s89_s13 }
   0x9   :  { %v46_v7 = vadd.f32 %v45_v6, %v44_v5 }
   0xa   :  { %p96_p3 = por %p95_p2, %p94_p1 }
   0xb   :  { %v47_v8 = vrot.slane %v46_v7, 1  ;;  %v22_v23 = vld [vmem:[#allocation2] sm:$0x1] }
   0xc   :  { %p97_p4 = pnand %p96_p3, %p90_p0 }
   0xd   :  { %v48_v10 = vadd.f32 %v47_v8, %v46_v7 }
   0xf   :  { %v49_v11 = vadd.f32 %v48_v10, %v40_v9 }
  0x11   :  { %51 = vst.msk [vmem:[#allocation3] sm:$0x1] %vm18_vm1, %v49_v11 }
  0x18   :  { %v55_v12 = vld [vmem:[#allocation3] sm:$0x1] }
  0x19   :  { %87 = vrcp.f32 %v55_v12 }
  0x23   :  { %v88_v13 = vpop.eup %87 }
  0x24   :  { %60 = vperm.xlu0 %86, %v88_v13  }
  0x82   :  { %v26_v15 = vpop.permute.xlu0 %25 }
  0x83   :  { %v28_v16 = vmul.f32 %v26_v15, %v21_v14 }
  0x85   :  { %v30_v17 = vsel %vm29_vm3, %v28_v16, 0.0 }
  0x86   :  { %v31_v18 = vrot.slane %v30_v17, 4 }
  0x88   :  { %v32_v19 = vadd.f32 %v31_v18, %v30_v17 }
  0x8a   :  { %v33_v20 = vrot.slane %v32_v19, 2 }
  0x8c   :  { %v34_v21 = vadd.f32 %v33_v20, %v32_v19 }
  0x8e   :  { %v35_v22 = vrot.slane %v34_v21, 1 }
  0x90   :  { %v36_v24 = vadd.f32 %v35_v22, %v34_v21 }
  0x92   :  { %v37_v25 = vadd.f32 %v36_v24, %v22_v23 }
  0x94   :  { %39 = vst.msk [vmem:[#allocation2] sm:$0x1] %vm16_vm2, %v37_v25 }
  0x9b   :  { %v57_v31 = vld [vmem:[#allocation2] sm:$0x1] }
  0xa3   :  { %v61_v29 = vpop.permute.xlu0 %60 }
  0xa4   :  { %v66_v30 = vrot.slane %v61_v29, %v65_v28 }
  0xa6   :  { %v67_v32 = vmul.f32 %v66_v30, %v57_v31 }
  0xa8   :  { %68 = vst.msk [vmem:[#allocation4] sm:$0x1] %vm16_vm2, %v67_v32 }
  0xa9   :  { %100 = shalt.err (!%p97_p4)
}
  0xaa   :  { %s101_s17 = scalar_lea.hbm %s156_s2, 16 }
  0xab   :  { %p102_p5 = scmp.ne.s32.totalorder %s156_s2, %s101_s17  ;;  %p105_p6 = scmp.lt.u32.totalorder %s101_s17, %s156_s2 }
  0xad   :  { %p107_p7 = pnand %p105_p6, %p102_p5 }
  0xaf   :  { %110 = shalt.err (!%p107_p7)
}
  0xb0   :  { %78 = dma.vmem_to_hbm [thread:$0]  %s76_s1, 16, %s156_s2, [#allocation5]  }
  0xb1   :  { %111 = dma.done.wait [#allocation5], 16  }
  0xb2   :  { %112 = vsyncadd [#allocation5], 4294967280 }
  0xb3   :  { %82 = vsyncpa [#allocation5], 1 }

</bundles_post_ra>
